<compile_context>
chip_gen: v5e
topology: v5e:2x2
jax: 0.10.0
libtpu: 0.0.40
codegen_flags: <defaults>
</compile_context>

<pallas_src>
import functools

import jax
import jax.numpy as jnp
from jax.experimental import pallas as pl
from jax.experimental.pallas import tpu as pltpu


def _final_layer_kernel(x_ref, shift_ref, scale1p_ref, w_lin_ref, b_lin_ref,
                        o_ref, *, eps):
    # x tile: (tq, H).  LayerNorm statistics in f32 regardless of input dtype.
    x = x_ref[...].astype(jnp.float32)
    mean = jnp.mean(x, axis=-1, keepdims=True)
    xc = x - mean
    var = jnp.mean(xc * xc, axis=-1, keepdims=True)
    xn = xc * jax.lax.rsqrt(var + eps)

    # modulate: broadcast (1, H) shift / (1 + scale) rows over the (tq, H) tile.
    y = xn * scale1p_ref[...] + shift_ref[...]

    # Final projection on the MXU; LHS in the weight dtype (bf16 fast path when
    # the weights are bf16) with an f32 accumulator.
    y = y.astype(w_lin_ref.dtype)
    out = jnp.dot(y, w_lin_ref[...], preferred_element_type=jnp.float32)
    out = out + b_lin_ref[...]
    o_ref[...] = out.astype(o_ref.dtype)


def _choose_tq(T, H, itemsize):
    """Pick a sequence tile: multiple of 8, double-buffered x tile ~<= 8 MiB."""
    budget = 8 << 20                       # bytes for 2 * (tq * H) of x
    tq = budget // max(1, 2 * H * itemsize)
    tq = max(8, min(1024, (tq // 8) * 8))  # amortize per-step overhead, cap VMEM
    if tq >= T:
        return T                           # full-extent block is always legal
    return tq


def final_layer_forward(x, c, w_ada, b_ada, w_lin, b_lin, *, eps=1e-6, tq=None):
    B, T, H = x.shape
    H2 = w_ada.shape[1]          # 2 * hidden_size
    D_out = w_lin.shape[1]       # patch_size * patch_size * out_channels
    assert H2 == 2 * H

    # ---- Hoisted adaLN branch: one batched (B,H)@(H,2H) matmul in XLA. ----
    silu_c = (c * jax.nn.sigmoid(c)).astype(jnp.float32)
    mod = jnp.dot(silu_c, w_ada, preferred_element_type=jnp.float32)
    mod = mod + b_ada.astype(jnp.float32)
    # (B, 1, H) so the kernel-facing blocks are full-extent in their last two
    # dims (guaranteed-legal TPU layout regardless of B / H).
    shift = mod[:, :H].reshape(B, 1, H)            # (B, 1, H) f32
    scale1p = (1.0 + mod[:, H:]).reshape(B, 1, H)  # (B, 1, H) f32

    b_lin2 = b_lin.reshape(1, D_out)

    if tq is None:
        tq = _choose_tq(T, H, x.dtype.itemsize)
    nt = pl.cdiv(T, tq)

    # VMEM budget: double buffers for x / out plus shift / scale1p / weights,
    # with headroom; clamp inside [16 MiB, 40 MiB] (safe even on v7x's 64 MiB).
    per_step = (tq * H * x.dtype.itemsize
                + tq * D_out * x.dtype.itemsize
                + 2 * H * 4
                + H * D_out * w_lin.dtype.itemsize
                + D_out * 4)
    vmem_limit = int(min(max(4 * per_step, 16 << 20), 40 << 20))

    cost = pl.CostEstimate(
        flops=int(2 * B * T * H * D_out + 10 * B * T * H),
        transcendentals=0,
        bytes_accessed=int(B * T * H * x.dtype.itemsize
                           + B * T * D_out * x.dtype.itemsize
                           + 2 * B * H * 4
                           + H * D_out * w_lin.dtype.itemsize
                           + D_out * 4),
    )

    kernel = functools.partial(_final_layer_kernel, eps=eps)

    return pl.pallas_call(
        kernel,
        out_shape=jax.ShapeDtypeStruct((B, T, D_out), x.dtype),
        grid_spec=pltpu.PrefetchScalarGridSpec(
            num_scalar_prefetch=0,
            grid=(B, nt),
            in_specs=[
                # x: (tq, H) tile per (batch, seq-tile) grid point.
                pl.BlockSpec((pl.Squeezed(), tq, H), lambda b, t: (b, t, 0)),
                # shift / (1 + scale): one (1, H) row per batch element; the
                # block index is constant across the inner (seq) grid axis.
                pl.BlockSpec((pl.Squeezed(), 1, H), lambda b, t: (b, 0, 0)),
                pl.BlockSpec((pl.Squeezed(), 1, H), lambda b, t: (b, 0, 0)),
                # final linear weight / bias: resident, constant block index.
                pl.BlockSpec((H, D_out), lambda b, t: (0, 0)),
                pl.BlockSpec((1, D_out), lambda b, t: (0, 0)),
            ],
            out_specs=pl.BlockSpec((pl.Squeezed(), tq, D_out),
                                   lambda b, t: (b, t, 0)),
        ),
        compiler_params=pltpu.CompilerParams(
            dimension_semantics=("parallel", "parallel"),
            vmem_limit_bytes=vmem_limit),
        cost_estimate=cost,
    )(x, shift, scale1p, w_lin, b_lin2)


def final_layer_reference(x, c, w_ada, b_ada, w_lin, b_lin, *, eps=1e-6):
    """Pure-JAX reference matching the PyTorch module semantics."""
    silu_c = c * jax.nn.sigmoid(c)
    mod = silu_c @ w_ada + b_ada
    H = x.shape[-1]
    shift, scale = mod[:, :H], mod[:, H:]
    mean = jnp.mean(x, axis=-1, keepdims=True)
    var = jnp.mean((x - mean) ** 2, axis=-1, keepdims=True)
    xn = (x - mean) / jnp.sqrt(var + eps)
    y = xn * (1.0 + scale[:, None, :]) + shift[:, None, :]
    return y @ w_lin + b_lin


if __name__ == "__main__":
    # Small, DiT-consistent shapes: hidden=32, patch=2, out_channels=4 -> D_out=16
    B, T, H = 2, 8, 32
    patch_size, out_channels = 2, 4
    D_out = patch_size * patch_size * out_channels

    key = jax.random.PRNGKey(0)
    kx, kc, k1, k2, k3, k4 = jax.random.split(key, 6)

    x = jax.random.normal(kx, (B, T, H), dtype=jnp.float32)
    c = jax.random.normal(kc, (B, H), dtype=jnp.float32)

    # Parameters stored as (in, out) so the kernel does y @ W + b
    # (equivalent to torch's x @ W.T + b).
    w_ada = jax.random.normal(k1, (H, 2 * H), dtype=jnp.float32) * 0.02
    b_ada = jax.random.normal(k2, (2 * H,), dtype=jnp.float32) * 0.02
    w_lin = jax.random.normal(k3, (H, D_out), dtype=jnp.float32) * 0.02
    b_lin = jax.random.normal(k4, (D_out,), dtype=jnp.float32) * 0.02

    out = final_layer_forward(x, c, w_ada, b_ada, w_lin, b_lin)
    out = jax.block_until_ready(out)

    ref = final_layer_reference(x, c, w_ada, b_ada, w_lin, b_lin)
    assert out.shape == (B, T, D_out)
    assert jnp.allclose(out, ref, atol=1e-5, rtol=1e-5), "mismatch vs reference"

    print("KERNEL_OK")
</pallas_src>

<mosaic_0001>
module attributes {stable_mosaic.version = 11 : i64} {
  func.func @_final_layer_kernel(%arg0: i32, %arg1: i32, %arg2: memref<1x8x32xf32, #tpu.memory_space<vmem>>, %arg3: memref<1x1x32xf32, #tpu.memory_space<vmem>>, %arg4: memref<1x1x32xf32, #tpu.memory_space<vmem>>, %arg5: memref<32x16xf32, #tpu.memory_space<vmem>>, %arg6: memref<1x16xf32, #tpu.memory_space<vmem>>, %arg7: memref<1x8x16xf32, #tpu.memory_space<vmem>>) attributes {dimension_semantics = [#tpu.dimension_semantics<parallel>, #tpu.dimension_semantics<parallel>], iteration_bounds = array<i64: 2, 1>, scalar_prefetch = 0 : i64, scratch_operands = 0 : i64, tpu.core_type = #tpu.core_type<tc>, window_params = [{transform_indices = @transform_0, window_bounds = array<i64: 1, 8, 32>}, {transform_indices = @transform_1, window_bounds = array<i64: 1, 1, 32>}, {transform_indices = @transform_2, window_bounds = array<i64: 1, 1, 32>}, {pipeline_mode = #tpu.pipeline_mode<synchronous>, transform_indices = @transform_3, window_bounds = array<i64: 32, 16>}, {pipeline_mode = #tpu.pipeline_mode<synchronous>, transform_indices = @transform_4, window_bounds = array<i64: 1, 16>}, {transform_indices = @transform_5, window_bounds = array<i64: 1, 8, 16>}]} {
    %c0 = arith.constant 0 : index
    %c0_0 = arith.constant 0 : index
    %c0_1 = arith.constant 0 : index
    %0 = vector.load %arg2[%c0, %c0_0, %c0_1] : memref<1x8x32xf32, #tpu.memory_space<vmem>>, vector<1x8x32xf32>
    %1 = vector.shape_cast %0 : vector<1x8x32xf32> to vector<8x32xf32>
    %cst = arith.constant dense<0.000000e+00> : vector<8xf32>
    %2 = vector.multi_reduction <add>, %1, %cst [1] : vector<8x32xf32> to vector<8xf32>
    %3 = vector.shape_cast %2 : vector<8xf32> to vector<8x1xf32>
    %cst_2 = arith.constant 3.200000e+01 : f32
    %4 = vector.broadcast %cst_2 : f32 to vector<8x1xf32>
    %5 = arith.divf %3, %4 : vector<8x1xf32>
    %6 = vector.broadcast %5 : vector<8x1xf32> to vector<8x32xf32>
    %7 = arith.subf %1, %6 : vector<8x32xf32>
    %8 = arith.mulf %7, %7 : vector<8x32xf32>
    %cst_3 = arith.constant dense<0.000000e+00> : vector<8xf32>
    %9 = vector.multi_reduction <add>, %8, %cst_3 [1] : vector<8x32xf32> to vector<8xf32>
    %10 = vector.shape_cast %9 : vector<8xf32> to vector<8x1xf32>
    %cst_4 = arith.constant 3.200000e+01 : f32
    %11 = vector.broadcast %cst_4 : f32 to vector<8x1xf32>
    %12 = arith.divf %10, %11 : vector<8x1xf32>
    %cst_5 = arith.constant 9.99999997E-7 : f32
    %13 = vector.broadcast %cst_5 : f32 to vector<8x1xf32>
    %14 = arith.addf %12, %13 : vector<8x1xf32>
    %15 = math.rsqrt %14 : vector<8x1xf32>
    %16 = vector.broadcast %15 : vector<8x1xf32> to vector<8x32xf32>
    %17 = arith.mulf %7, %16 : vector<8x32xf32>
    %c0_6 = arith.constant 0 : index
    %c0_7 = arith.constant 0 : index
    %c0_8 = arith.constant 0 : index
    %18 = vector.load %arg4[%c0_6, %c0_7, %c0_8] : memref<1x1x32xf32, #tpu.memory_space<vmem>>, vector<1x1x32xf32>
    %19 = vector.shape_cast %18 : vector<1x1x32xf32> to vector<1x32xf32>
    %20 = vector.broadcast %19 : vector<1x32xf32> to vector<8x32xf32>
    %21 = arith.mulf %17, %20 : vector<8x32xf32>
    %c0_9 = arith.constant 0 : index
    %c0_10 = arith.constant 0 : index
    %c0_11 = arith.constant 0 : index
    %22 = vector.load %arg3[%c0_9, %c0_10, %c0_11] : memref<1x1x32xf32, #tpu.memory_space<vmem>>, vector<1x1x32xf32>
    %23 = vector.shape_cast %22 : vector<1x1x32xf32> to vector<1x32xf32>
    %24 = vector.broadcast %23 : vector<1x32xf32> to vector<8x32xf32>
    %25 = arith.addf %21, %24 : vector<8x32xf32>
    %c0_12 = arith.constant 0 : index
    %c0_13 = arith.constant 0 : index
    %26 = vector.load %arg5[%c0_12, %c0_13] : memref<32x16xf32, #tpu.memory_space<vmem>>, vector<32x16xf32>
    %cst_14 = arith.constant dense<0.000000e+00> : vector<8x16xf32>
    %27 = tpu.matmul %25, %26, %cst_14 {dimension_numbers = #tpu.dot_dimension_numbers<[1], [0], [0], [1], [0, 0, 1, 1], [], []>} : vector<8x32xf32>, vector<32x16xf32>, vector<8x16xf32> -> vector<8x16xf32>
    %c0_15 = arith.constant 0 : index
    %c0_16 = arith.constant 0 : index
    %28 = vector.load %arg6[%c0_15, %c0_16] : memref<1x16xf32, #tpu.memory_space<vmem>>, vector<1x16xf32>
    %29 = vector.broadcast %28 : vector<1x16xf32> to vector<8x16xf32>
    %30 = arith.addf %27, %29 : vector<8x16xf32>
    %c0_17 = arith.constant 0 : index
    %c0_18 = arith.constant 0 : index
    %c0_19 = arith.constant 0 : index
    %31 = vector.load %arg7[%c0_17, %c0_18, %c0_19] : memref<1x8x16xf32, #tpu.memory_space<vmem>>, vector<1x8x16xf32>
    %32 = vector.shape_cast %31 : vector<1x8x16xf32> to vector<8x16xf32>
    %33 = vector.shape_cast %30 : vector<8x16xf32> to vector<1x8x16xf32>
    tpu.vector_store %arg7[%c0_17, %c0_18, %c0_19], %33 {strides = array<i32>} : memref<1x8x16xf32, #tpu.memory_space<vmem>>, vector<1x8x16xf32>,
    return
  }
  func.func @transform_0(%arg0: i32, %arg1: i32) -> (i32, i32, i32) {
    %c0_i32 = arith.constant 0 : i32
    %c0_i32_0 = arith.constant 0 : i32
    return %arg0, %arg1, %c0_i32 : i32, i32, i32
  }
  func.func @transform_1(%arg0: i32, %arg1: i32) -> (i32, i32, i32) {
    %c0_i32 = arith.constant 0 : i32
    %c0_i32_0 = arith.constant 0 : i32
    %c0_i32_1 = arith.constant 0 : i32
    return %arg0, %c0_i32, %c0_i32_0 : i32, i32, i32
  }
  func.func @transform_2(%arg0: i32, %arg1: i32) -> (i32, i32, i32) {
    %c0_i32 = arith.constant 0 : i32
    %c0_i32_0 = arith.constant 0 : i32
    %c0_i32_1 = arith.constant 0 : i32
    return %arg0, %c0_i32, %c0_i32_0 : i32, i32, i32
  }
  func.func @transform_3(%arg0: i32, %arg1: i32) -> (i32, i32) {
    %c0_i32 = arith.constant 0 : i32
    %c0_i32_0 = arith.constant 0 : i32
    %c0_i32_1 = arith.constant 0 : i32
    return %c0_i32, %c0_i32_0 : i32, i32
  }
  func.func @transform_4(%arg0: i32, %arg1: i32) -> (i32, i32) {
    %c0_i32 = arith.constant 0 : i32
    %c0_i32_0 = arith.constant 0 : i32
    %c0_i32_1 = arith.constant 0 : i32
    return %c0_i32, %c0_i32_0 : i32, i32
  }
  func.func @transform_5(%arg0: i32, %arg1: i32) -> (i32, i32, i32) {
    %c0_i32 = arith.constant 0 : i32
    %c0_i32_0 = arith.constant 0 : i32
    return %arg0, %arg1, %c0_i32 : i32, i32, i32
  }
}

</mosaic_0001>

<bundles_post_ra>
// kernel: tpu_custom_call.1
= control target key start
LH: loop header
LB: loop body
LE: loop exit
PB: predicated region body
PF: predicated region fallthrough
CT: control target
= control target key end

     0   :  { %10 = vsyncpa [#allocation3], 0  ;;  %s765_s0 = inlined_call_operand.vmem [shape: f32[2,8,32], index: 0, kind: input, shape index: {}]   ;;  %s766_s1 = inlined_call_operand.vmem [shape: f32[2,1,32], index: 1, kind: input, shape index: {}]   ;;  %s767_s2 = inlined_call_operand.vmem [shape: f32[2,1,32], index: 2, kind: input, shape index: {}]   ;;  %s768_s3 = inlined_call_operand.vmem [shape: f32[32,16], index: 3, kind: input, shape index: {}]   ;;  %s769_s4 = inlined_call_operand.vmem [shape: f32[1,16], index: 4, kind: input, shape index: {}]   ;;  %s770_s5 = inlined_call_operand.hbm [shape: f32[2,8,16], index: 5, kind: output, shape index: {}]  }
   0x1   :  { %12 = vsyncpa [#allocation3 + $0x1], 0  ;;  %s639_s18 = smov 0   ;;  %s641_s19 = smov 0  }
   0x2   :  { %s643_s20 = smov 0   ;;  %s645_s21 = smov 0  }
   0x3   :  { %s647_s22 = smov 0   ;;  %s649_s23 = smov 0  }
   0x4 LB: > { %s453_s24 = sadd.s32 4294967295, %s606_s23   ;;  %s454_s25 = sadd.s32 4294967294, %s606_s23   ;;  %s606_s23 = sphi %s649_s23, %s18_s23   ;;  %s602_s22 = sphi %s647_s22, %s777_s22   ;;  %s598_s21 = sphi %s645_s21, %s776_s21   ;;  %s594_s20 = sphi %s643_s20, %s775_s20   ;;  %s590_s19 = sphi %s641_s19, %s774_s19   ;;  %s586_s18 = sphi %s639_s18, %s773_s18  }
   0x5   : > { %s30_s26 = sadd.s32 1, %s602_s22  ;;  %s161_s27 = sadd.s32 1, %s594_s20 }
   0x6   : > { %p32_p0 = scmp.ge.s32.totalorder %s30_s26, 2  ;;  %p171_p1 = scmp.ne.s32.totalorder %s594_s20, %s590_s19 }
   0x7   : > { %p172_p2 = scmp.eq.s32.totalorder %s453_s24, 1  ;;  %p177_p3 = scmp.ne.s32.totalorder %s590_s19, %s586_s18 }
   0x8   : > { %s779_s26 = smov (%p32_p0, %s30_s26), 0  ;;  %p178_p5 = scmp.eq.s32.totalorder %s454_s25, 1 }
   0x9   : > { %p679_p4 = por %p172_p2, %p171_p1  ;;  %s156_s29 = ssub.s32 %s602_s22, %s779_s26 }
   0xa   : > { %p457_p6 = scmp.ge.s32.totalorder %s606_s23, 1  ;;  %p159_p7 = scmp.eq.s32.totalorder %s156_s29, 0 }
   0xb   : > { %p686_p8 = por %p178_p5, %p177_p3  ;;  %p224_p9 = scmp.lt.s32.totalorder %s606_s23, 3 }
   0xc   : > { %s692_s6 = scalar_select %p159_p7, %s594_s20, %s161_s27  }
   0xd   : > { %p225_p10 = pnand %p457_p6, %p224_p9 }
   0xe   : > { %p260_p11 = scmp.lt.s32.totalorder (!%p225_p10), %s598_s21, 1  ;;  %s462_s13 = sshll.u32 (!%p225_p10), %s598_s21, 3 }
   0xf   : > { %228 = sbr.rel (%p225_p10) target bundleno = 424 (0x1a8), region = 40  ;;  %s359_s24 = scalar_lea.hbm (!%p225_p10), %s770_s5, %s462_s13 }
  0x14   : > { %s696_s7 = scalar_select %p260_p11, %s598_s21, 1  ;;  %vm274_vm0 = vcmask 261120   ;;  %v608_v2 = vmov 32.0   ;;  %v317_v14 = vld [vmem:[%s768_s3 + $0x18] sm:$0xff]  ;;  %v316_v15 = vld [vmem:[%s768_s3 + $0x10] sm:$0xff]  ;;  %v315_v16 = vld [vmem:[%s768_s3 + $0x8] sm:$0xff] }
  0x15   : > { %524 = vrcp.f32 %v608_v2  ;;  %337 = vmatpush.msra.mxu0 %v317_v14  ;;  %v314_v17 = vld [vmem:[%s768_s3] sm:$0xff]  ;;  %vm345_vm5 = vcmask 130048  }
  0x16   : > { %s459_s8 = sshll.u32 %s696_s7, 3  ;;  %s269_s14 = scalar_lea.vmem %s766_s1, %s696_s7  ;;  %v523_v33 = vld [vmem:[%s769_s4] ss:$0 sm:$0xff] }
  0x17   : > { %s266_s11 = scalar_lea.vmem %s765_s0, %s459_s8  ;;  %s272_s17 = scalar_lea.vmem %s767_s2, %s696_s7  ;;  %338 = vmatpush.msra.mxu0 %v316_v15  ;;  %v522_v30 = vld [vmem:[%s269_s14] ss:$0 sm:$0xff] }
  0x18   : > { %v273_v0 = vld [vmem:[%s266_s11] sm:$0xff]  ;;  %s257_s7 = sand.u32 1, %s590_s19   ;;  %s363_s8 = sshll.u32 %s359_s24, 4  ;;  %s364_s8 = int_to_ptr.hbm [resolvable:$true] %s363_s8 }
  0x19   : > { %v275_v1 = vsel %vm274_vm0, %v273_v0, 0.0  ;;  %339 = vmatpush.msra.mxu0 %v315_v16  ;;  %v521_v27 = vld [vmem:[%s272_s17] ss:$0 sm:$0xff]  ;;  %s458_s12 = sshll.u32 %s257_s7, 3  ;;  %s348_s14 = scalar_lea.sflag [#allocation3], %s257_s7 }
  0x1a   : > { %276 = vadd.xlane.f32.xlu0 %v275_v1  ;;  %s259_s17 = scalar_lea.vmem [#allocation2], %s458_s12  ;;  %s542_s21 = sshra.s32 %s364_s8, 4  ;;  %s543_s21 = int_to_ptr.hbm [resolvable:$true] %s542_s21 }
  0x1b   : > { %v525_v3 = vpop.eup %524  ;;  %340 = vmatpush.msra.mxu0 %v314_v17  ;;  %s361_s29 = sshll.u32 %s259_s17, 4  ;;  %s544_s9 = scalar_lea.hbm %s543_s21, 8  ;;  %s362_s29 = int_to_ptr.vmem [resolvable:$true] %s361_s29 }
  0x1c   : > { %v279_v4 = vmul.f32 32.0, %v525_v3  ;;  %vm283_vm1 = vweird.f32 %v525_v3  ;;  %p545_p12 = scmp.ne.s32.totalorder %s543_s21, %s544_s9  ;;  %s548_s12 = scalar_lea.hbm %s770_s5, 16 }
  0x1d   : > { %p549_p1 = scmp.lt.s32.totalorder %s543_s21, %s770_s5  ;;  %p550_p2 = scmp.lt.s32.totalorder %s548_s12, %s544_s9 }
  0x1e   : > { %v280_v5 = vsub.f32 1.0, %v279_v4  ;;  %p546_p13 = pnand %p545_p12, %p679_p4 }
  0x1f   : > { %p551_p3 = por %p550_p2, %p549_p1 }
  0x20   : > { %v281_v6 = vmul.f32 %v525_v3, %v280_v5  ;;  %p547_p0 = pneg %p546_p13 }
  0x22   : > { %v282_v7 = vadd.f32 %v525_v3, %v281_v6  ;;  %p552_p5 = pnand %p551_p3, %p547_p0 }
  0x24   : > { %v284_v8 = vsel %vm283_vm1, %v525_v3, %v282_v7 }
  0x8d   : > { %v277_v9 = vpop.xlane.xlu0 %276 }
  0x8e   : > { %v285_v10 = vmul.f32 %v284_v8, %v277_v9 }
  0x90   : > { %v286_v11 = vsub.f32 %v273_v0, %v285_v10 }
  0x92   : > { %v287_v12 = vmul.f32 %v286_v11, %v286_v11 }
  0x94   : > { %v288_v13 = vsel %vm274_vm0, %v287_v12, 0.0 }
  0x95   : > { %289 = vadd.xlane.f32.xlu0 %v288_v13 }
 0x108   : > { %v290_v18 = vpop.xlane.xlu0 %289 }
 0x109   : > { %v291_v19 = vmul.f32 %v290_v18, %v284_v8 }
 0x10b   : > { %v292_v20 = vadd.f32 1e-06, %v291_v19 }
 0x10d   : > { %526 = vrsqrt.f32 %v292_v20  ;;  %vm299_vm3 = vweird.f32 %v292_v20 }
 0x113   : > { %v527_v21 = vpop.eup %526 }
 0x114   : > { %v294_v22 = vmul.f32 %v527_v21, %v292_v20  ;;  %vm300_vm2 = vweird.f32 %v527_v21 }
 0x115   : > { %vm301_vm4 = vmor %vm299_vm3, %vm300_vm2 }
 0x116   : > { %v295_v23 = vmul.f32 %v527_v21, %v294_v22 }
 0x118   : > { %v296_v24 = vmul.f32 0.5, %v295_v23 }
 0x11a   : > { %v297_v25 = vsub.f32 1.5, %v296_v24 }
 0x11c   : > { %v298_v26 = vmul.f32 %v527_v21, %v297_v25 }
 0x11e   : > { %v302_v28 = vsel %vm301_vm4, %v527_v21, %v298_v26 }
 0x11f   : > { %v303_v29 = vmul.f32 %v302_v28, %v286_v11 }
 0x121   : > { %v308_v31 = vmul.f32 %v521_v27, %v303_v29 }
 0x123   : > { %v313_v32 = vadd.f32 %v522_v30, %v308_v31 }
 0x125   : > { %460 = vmatmul.msk.f32.vlgmr.msra.gmra.mxu0 %vm274_vm0, %v313_v32 }
 0x1a2   : > { %v342_v34 = vpop.f32.mrf.mxu0 }
 0x1a3   : > { %v343_v35 = vadd.f32 %v523_v33, %v342_v34 }
 0x1a5   : > { %346 = vst.msk [vmem:[%s259_s17] sm:$0xff] %vm345_vm5, %v343_v35 }
 0x1a6   : > { %555 = shalt.err (!%p552_p5)
}
 0x1a7   : > { %465 = dma.vmem_to_hbm [thread:$0]  (%p679_p4), %s362_s29, 128, %s364_s8, %s348_s14  }
 0x1a8 PF: > { %p471_p6 = scmp.ge.s32.totalorder %s606_s23, 2  ;;  %s375_s7 = sand.u32 1, %s586_s18  }
 0x1a9   : > { %s376_s16 = scalar_lea.sflag [#allocation3], %s375_s7 }
 0x1aa   : > { %p468_p7 = pnand %p471_p6, %p686_p8 }
 0x1ac   : > { %p469_p9 = pneg %p468_p7 }
 0x1ae   : > { %581 = dma.done.wait (%p469_p9), %s376_s16, 128  }
 0x1af   : > { %583 = vsyncadd (%p469_p9), %s376_s16, 4294967168  ;;  %s18_s23 = sadd.s32 1, %s606_s23   ;;  %s773_s18 = smov %s590_s19 }
 0x1b0   : > { %p15_p10 = scmp.ge.s32.totalorder %s18_s23, 4   ;;  %s774_s19 = smov %s594_s20 }
 0x1b1   : > { %s775_s20 = smov %s692_s6  ;;  %s776_s21 = smov %s602_s22 }
 0x1b2   : > { %s777_s22 = smov %s779_s26  ;;  %17 = sbr.rel (!%p15_p10) target bundleno = 4 (0x4), region = 81 }
 0x1b7   :  { %382 = vsyncpa [#allocation3], 1 }
 0x1b8   :  { %384 = vsyncpa [#allocation3 + $0x1], 1 }

</bundles_post_ra>
